<compile_context>
chip_gen: v6e
topology: v6e:2x2x1
jax: 0.10.0
libtpu: 0.0.40
codegen_flags: <defaults>
</compile_context>

<pallas_src>
import math
import jax
import jax.numpy as jnp
from jax.experimental import pallas as pl
from jax.experimental.pallas import tpu as pltpu


def ffn_kernel(x_ref, w1_ref, w2_ref, o_ref, acc_ref):
    # x_ref: (tm, H) bf16, w1_ref: (H, tf) bf16, w2_ref: (tf, H) bf16
    # o_ref: (tm, H) out dtype, acc_ref: (tm, H) f32 accumulator
    f = pl.program_id(1)

    @pl.when(f == 0)
    def _init():
        acc_ref[...] = jnp.zeros_like(acc_ref)

    # First matmul slice + ReLU (f32), downcast to bf16 for second matmul.
    h = jnp.dot(x_ref[...], w1_ref[...], preferred_element_type=jnp.float32)
    h = jnp.maximum(h, 0.0)
    acc_ref[...] += jnp.dot(h.astype(w2_ref.dtype), w2_ref[...],
                            preferred_element_type=jnp.float32)

    @pl.when(f == pl.num_programs(1) - 1)
    def _finalize():
        o_ref[...] = acc_ref[...].astype(o_ref.dtype)


def _round_up(x, m):
    return ((x + m - 1) // m) * m


def _pick_ff_tile(F, target):
    """Largest multiple of 128 that divides F and is <= target (else full F)."""
    if F <= target:
        return F
    tf = (target // 128) * 128
    while tf > 128 and F % tf != 0:
        tf -= 128
    return tf if F % tf == 0 else F


def feed_forward(x, w1, w2, *, tm_target=256, tf_target=1024,
                 compute_dtype=jnp.bfloat16):
    """x: (B, S, H); w1: (H, 4H); w2: (4H, H). Returns (B, S, H).

    Weights are stored transposed vs. PyTorch nn.Linear, i.e. (in, out).
    """
    B, S, H = x.shape
    F = w1.shape[1]
    assert w1.shape == (H, F) and w2.shape == (F, H)

    M = B * S
    out_dtype = x.dtype

    # Row tile: big for MXU utilization, multiple of 8 (bf16-friendly),
    # never larger than (padded) M.
    tm = min(tm_target, _round_up(M, 8))
    M_pad = _round_up(M, tm)

    # FF tile: multiple of 128 dividing F (or full F for tiny problems).
    tf = _pick_ff_tile(F, tf_target)

    x2d = x.reshape(M, H).astype(compute_dtype)
    if M_pad != M:
        x2d = jnp.pad(x2d, ((0, M_pad - M), (0, 0)))
    w1c = w1.astype(compute_dtype)
    w2c = w2.astype(compute_dtype)

    itemsize = jnp.dtype(compute_dtype).itemsize
    vmem_bytes = (
        2 * (tm * H + H * tf + tf * H) * itemsize          # double-buffered inputs
        + 2 * tm * H * jnp.dtype(out_dtype).itemsize        # double-buffered output
        + tm * H * 4                                        # f32 accumulator
    )
    vmem_limit = min(max(int(vmem_bytes * 2), 32 << 20), 100 << 20)

    grid = (M_pad // tm, F // tf)

    out2d = pl.pallas_call(
        ffn_kernel,
        out_shape=jax.ShapeDtypeStruct((M_pad, H), out_dtype),
        grid_spec=pltpu.PrefetchScalarGridSpec(
            num_scalar_prefetch=0,
            grid=grid,
            in_specs=[
                pl.BlockSpec((tm, H), lambda i, f: (i, 0)),   # x row tile
                pl.BlockSpec((H, tf), lambda i, f: (0, f)),   # W1 FF slice
                pl.BlockSpec((tf, H), lambda i, f: (f, 0)),   # W2 FF slice
            ],
            out_specs=pl.BlockSpec((tm, H), lambda i, f: (i, 0)),
            scratch_shapes=[pltpu.VMEM((tm, H), jnp.float32)],
        ),
        compiler_params=pltpu.CompilerParams(
            dimension_semantics=("parallel", "arbitrary"),
            vmem_limit_bytes=vmem_limit,
        ),
    )(x2d, w1c, w2c)

    if M_pad != M:
        out2d = out2d[:M]
    return out2d.reshape(B, S, H)


def init_params(key, hidden_size, dtype=jnp.float32):
    """Deterministic init mirroring nn.Linear's Kaiming-uniform bound
    (U(-1/sqrt(fan_in), 1/sqrt(fan_in))), stored as (in, out)."""
    k1, k2 = jax.random.split(key)
    b1 = 1.0 / math.sqrt(hidden_size)
    b2 = 1.0 / math.sqrt(hidden_size * 4)
    w1 = jax.random.uniform(k1, (hidden_size, hidden_size * 4),
                            minval=-b1, maxval=b1, dtype=dtype)
    w2 = jax.random.uniform(k2, (hidden_size * 4, hidden_size),
                            minval=-b2, maxval=b2, dtype=dtype)
    return w1, w2


if __name__ == "__main__":
    key = jax.random.PRNGKey(0)
    kx, kp = jax.random.split(key)

    batch, seq, hidden = 2, 8, 32   # hidden*4 = 128 -> lane-aligned FF dim
    x = jax.random.normal(kx, (batch, seq, hidden), dtype=jnp.float32)
    w1, w2 = init_params(kp, hidden)

    out = feed_forward(x, w1, w2)
    out = jax.block_until_ready(out)

    # Correctness check vs. plain-JAX f32 reference (eval-mode dropout = identity).
    # Tolerance loosened because matmul operands are bf16 (f32 accumulation).
    ref = jnp.maximum(x.reshape(-1, hidden) @ w1, 0.0) @ w2
    ref = ref.reshape(batch, seq, hidden)
    assert out.shape == (batch, seq, hidden)
    assert jnp.all(jnp.isfinite(out))
    assert jnp.allclose(out.astype(jnp.float32), ref, atol=5e-2, rtol=5e-2), (
        float(jnp.max(jnp.abs(out.astype(jnp.float32) - ref))))

    print("KERNEL_OK")
</pallas_src>

<mosaic_0001>
module attributes {stable_mosaic.version = 11 : i64} {
  func.func @ffn_kernel(%arg0: i32, %arg1: i32, %arg2: memref<16x32xbf16, #tpu.memory_space<vmem>>, %arg3: memref<32x128xbf16, #tpu.memory_space<vmem>>, %arg4: memref<128x32xbf16, #tpu.memory_space<vmem>>, %arg5: memref<16x32xf32, #tpu.memory_space<vmem>>, %arg6: memref<16x32xf32, #tpu.memory_space<vmem>>) attributes {dimension_semantics = [#tpu.dimension_semantics<parallel>, #tpu.dimension_semantics<arbitrary>], iteration_bounds = array<i64: 1, 1>, scalar_prefetch = 0 : i64, scratch_operands = 1 : i64, tpu.core_type = #tpu.core_type<tc>, window_params = [{transform_indices = @transform_0, window_bounds = array<i64: 16, 32>}, {transform_indices = @transform_1, window_bounds = array<i64: 32, 128>}, {transform_indices = @transform_2, window_bounds = array<i64: 128, 32>}, {transform_indices = @transform_3, window_bounds = array<i64: 16, 32>}]} {
    %c0_i32 = arith.constant 0 : i32
    %0 = arith.cmpi eq, %arg1, %c0_i32 : i32
    %1 = arith.extui %0 : i1 to i32
    %c0_i32_0 = arith.constant 0 : i32
    %2 = arith.cmpi ne, %1, %c0_i32_0 : i32
    scf.if %2 {
      %cst_14 = arith.constant 0.000000e+00 : f32
      %17 = vector.broadcast %cst_14 : f32 to vector<16x32xf32>
      %c0_15 = arith.constant 0 : index
      %c0_16 = arith.constant 0 : index
      %18 = vector.load %arg6[%c0_15, %c0_16] : memref<16x32xf32, #tpu.memory_space<vmem>>, vector<16x32xf32>
      tpu.vector_store %arg6[%c0_15, %c0_16], %17 {strides = array<i32>} : memref<16x32xf32, #tpu.memory_space<vmem>>, vector<16x32xf32>,
    } else {
    }
    %c0 = arith.constant 0 : index
    %c0_1 = arith.constant 0 : index
    %3 = vector.load %arg2[%c0, %c0_1] : memref<16x32xbf16, #tpu.memory_space<vmem>>, vector<16x32xbf16>
    %c0_2 = arith.constant 0 : index
    %c0_3 = arith.constant 0 : index
    %4 = vector.load %arg3[%c0_2, %c0_3] : memref<32x128xbf16, #tpu.memory_space<vmem>>, vector<32x128xbf16>
    %cst = arith.constant dense<0.000000e+00> : vector<16x128xf32>
    %5 = tpu.matmul %3, %4, %cst {dimension_numbers = #tpu.dot_dimension_numbers<[1], [0], [0], [1], [0, 0, 1, 1], [], []>} : vector<16x32xbf16>, vector<32x128xbf16>, vector<16x128xf32> -> vector<16x128xf32>
    %cst_4 = arith.constant 0.000000e+00 : f32
    %6 = vector.broadcast %cst_4 : f32 to vector<16x128xf32>
    %7 = arith.maximumf %5, %6 : vector<16x128xf32>
    %c0_5 = arith.constant 0 : index
    %c0_6 = arith.constant 0 : index
    %8 = vector.load %arg6[%c0_5, %c0_6] : memref<16x32xf32, #tpu.memory_space<vmem>>, vector<16x32xf32>
    %9 = arith.truncf %7 : vector<16x128xf32> to vector<16x128xbf16>
    %c0_7 = arith.constant 0 : index
    %c0_8 = arith.constant 0 : index
    %10 = vector.load %arg4[%c0_7, %c0_8] : memref<128x32xbf16, #tpu.memory_space<vmem>>, vector<128x32xbf16>
    %cst_9 = arith.constant dense<0.000000e+00> : vector<16x32xf32>
    %11 = tpu.matmul %9, %10, %cst_9 {dimension_numbers = #tpu.dot_dimension_numbers<[1], [0], [0], [1], [0, 0, 1, 1], [], []>} : vector<16x128xbf16>, vector<128x32xbf16>, vector<16x32xf32> -> vector<16x32xf32>
    %12 = arith.addf %8, %11 : vector<16x32xf32>
    %c0_10 = arith.constant 0 : index
    %c0_11 = arith.constant 0 : index
    %13 = vector.load %arg6[%c0_10, %c0_11] : memref<16x32xf32, #tpu.memory_space<vmem>>, vector<16x32xf32>
    tpu.vector_store %arg6[%c0_10, %c0_11], %12 {strides = array<i32>} : memref<16x32xf32, #tpu.memory_space<vmem>>, vector<16x32xf32>,
    %c0_i32_12 = arith.constant 0 : i32
    %14 = arith.cmpi eq, %arg1, %c0_i32_12 : i32
    %15 = arith.extui %14 : i1 to i32
    %c0_i32_13 = arith.constant 0 : i32
    %16 = arith.cmpi ne, %15, %c0_i32_13 : i32
    scf.if %16 {
      %c0_14 = arith.constant 0 : index
      %c0_15 = arith.constant 0 : index
      %17 = vector.load %arg6[%c0_14, %c0_15] : memref<16x32xf32, #tpu.memory_space<vmem>>, vector<16x32xf32>
      %c0_16 = arith.constant 0 : index
      %c0_17 = arith.constant 0 : index
      %18 = vector.load %arg5[%c0_16, %c0_17] : memref<16x32xf32, #tpu.memory_space<vmem>>, vector<16x32xf32>
      tpu.vector_store %arg5[%c0_16, %c0_17], %17 {strides = array<i32>} : memref<16x32xf32, #tpu.memory_space<vmem>>, vector<16x32xf32>,
    } else {
    }
    return
  }
  func.func @transform_0(%arg0: i32, %arg1: i32) -> (i32, i32) {
    %c0_i32 = arith.constant 0 : i32
    %c0_i32_0 = arith.constant 0 : i32
    return %arg0, %c0_i32 : i32, i32
  }
  func.func @transform_1(%arg0: i32, %arg1: i32) -> (i32, i32) {
    %c0_i32 = arith.constant 0 : i32
    %c0_i32_0 = arith.constant 0 : i32
    return %c0_i32, %arg1 : i32, i32
  }
  func.func @transform_2(%arg0: i32, %arg1: i32) -> (i32, i32) {
    %c0_i32 = arith.constant 0 : i32
    %c0_i32_0 = arith.constant 0 : i32
    return %arg1, %c0_i32 : i32, i32
  }
  func.func @transform_3(%arg0: i32, %arg1: i32) -> (i32, i32) {
    %c0_i32 = arith.constant 0 : i32
    %c0_i32_0 = arith.constant 0 : i32
    return %arg0, %c0_i32 : i32, i32
  }
}

</mosaic_0001>

<bundles_post_ra>
// kernel: tpu_custom_call.1
= control target key start
LH: loop header
LB: loop body
LE: loop exit
PB: predicated region body
PF: predicated region fallthrough
CT: control target
= control target key end

     0   :  { %v318_v1 = vmov 0.0   ;;  %vm319_vm0 = vmmov 0   ;;  %vm20_vm1 = vcmask 261120   ;;  %s386_s0 = inlined_call_operand.vmem [shape: bf16[16,32], index: 0, kind: input, shape index: {}]   ;;  %s387_s1 = inlined_call_operand.vmem [shape: bf16[32,128], index: 1, kind: input, shape index: {}]   ;;  %s388_s2 = inlined_call_operand.vmem [shape: bf16[128,32], index: 2, kind: input, shape index: {}]   ;;  %s389_s3 = inlined_call_operand.hbm [shape: f32[16,32], index: 3, kind: output, shape index: {}]  }
   0x1   :  { %v285_v0 = vld [vmem:[%s387_s1 + $0x8] sm:$0xff]   ;;  %252 = vmatprep.subr.bf16.mxu0 %v318_v1  ;;  %260 = vmatprep.subr.bf16.mxu1 %v318_v1  ;;  %v286_v2 = vld [vmem:[%s387_s1] sm:$0xff]   ;;  %21 = vst.msk [vmem:[#allocation2] sm:$0xff] %vm20_vm1, %v318_v1  ;;  %22 = vst.msk [vmem:[#allocation2 + $0x8] sm:$0xff] %vm20_vm1, %v318_v1 }
   0x2   :  { %253 = vmatpush3.bf16.msra.mxu0 %v285_v0  ;;  %256 = vmatprep.mubr.msk.bf16.mxu0 %vm319_vm0, %v318_v1  ;;  %v288_v3 = vld [vmem:[%s388_s2 + $0x38] sm:$0xff]   ;;  %v287_v4 = vld [vmem:[%s386_s0] sm:$0xff]   ;;  %v289_v5 = vld [vmem:[%s388_s2 + $0x30] sm:$0xff]  }
   0x3   :  { %254 = vmatprep.subr.bf16.mxu0 %v318_v1  ;;  %276 = vmatprep.mubr.msk.bf16.mxu1 %vm319_vm0, %v318_v1  ;;  %v290_v6 = vld [vmem:[%s388_s2 + $0x28] sm:$0xff]  }
   0x4   :  { %261 = vmatpush3.bf16.msra.mxu1 %v288_v3 }
   0x5   :  { %262 = vmatprep.subr.bf16.mxu1 %v318_v1 }
   0x6   :  { %255 = vmatpush3.bf16.msra.mxu0 %v286_v2 }
   0x8   :  { %263 = vmatpush3.bf16.msra.mxu1 %v289_v5 }
   0x9   :  { %257 = vmatmul.mubr.msk.bf16.vlgmr.msra.gmra.mxu0 %vm20_vm1, %v287_v4  ;;  %264 = vmatprep.subr.bf16.mxu1 %v318_v1 }
   0xa   :  { %8 = vsyncpa [#allocation4], 0  ;;  %v291_v7 = vld [vmem:[%s388_s2 + $0x20] sm:$0xff]   ;;  %v292_v8 = vld [vmem:[%s388_s2 + $0x18] sm:$0xff]  }
   0xb   :  { %v293_v9 = vld [vmem:[%s388_s2 + $0x10] sm:$0xff]   ;;  %v294_v10 = vld [vmem:[%s388_s2 + $0x8] sm:$0xff]   ;;  %v295_v11 = vld [vmem:[%s388_s2] sm:$0xff]   ;;  %s320_s2 = smov [#allocation3]  }
   0xc   :  { %265 = vmatpush3.bf16.msra.mxu1 %v290_v6  ;;  %v93_v19 = vld [vmem:[#allocation2] sm:$0xff]  ;;  %v94_v23 = vld [vmem:[#allocation2 + $0x8] sm:$0xff]  ;;  %s217_s5 = sshll.u32 %s320_s2, 4  ;;  %s218_s5 = int_to_ptr.vmem [resolvable:$true] %s217_s5 }
   0xd   :  { %266 = vmatprep.subr.bf16.mxu1 %v318_v1  ;;  %s296_s6 = scalar_lea.vmem %s218_s5, 256  ;;  %p301_p1 = scmp.lt.s32.totalorder %s218_s5, %s218_s5 }
   0xe   :  { %p297_p0 = scmp.ne.s32.totalorder %s218_s5, %s296_s6  ;;  %p302_p2 = scmp.lt.s32.totalorder %s296_s6, %s296_s6 }
  0x10   :  { %267 = vmatpush3.bf16.msra.mxu1 %v291_v7  ;;  %p303_p3 = por %p302_p2, %p301_p1 }
  0x11   :  { %268 = vmatprep.subr.bf16.mxu1 %v318_v1 }
  0x12   :  { %p304_p4 = pnand %p303_p3, %p297_p0 }
  0x14   :  { %269 = vmatpush3.bf16.msra.mxu1 %v292_v8 }
  0x15   :  { %270 = vmatprep.subr.bf16.mxu1 %v318_v1 }
  0x18   :  { %271 = vmatpush3.bf16.msra.mxu1 %v293_v9 }
  0x19   :  { %272 = vmatprep.subr.bf16.mxu1 %v318_v1 }
  0x1c   :  { %273 = vmatpush3.bf16.msra.mxu1 %v294_v10 }
  0x1d   :  { %274 = vmatprep.subr.bf16.mxu1 %v318_v1 }
  0x20   :  { %275 = vmatpush3.bf16.msra.mxu1 %v295_v11 }
  0xc9   :  { %v84_v12 = vpop.f32.mrf.mxu0 }
  0xca   :  { %v91_v15 = vmax.f32 %v84_v12, 0.0 }
  0xcb   :  { %v258_v13 = vpop.f32.mrf.mxu0 }
  0xcd   :  { %v87_v14 = vpop.f32.mrf.mxu0 }
  0xce   :  { %v92_v16 = vmax.f32 %v87_v14, 0.0 }
  0xcf   :  { %v259_v17 = vpop.f32.mrf.mxu0 }
  0xd0   :  { %v95_v18 = vpack.c.bf16 %v92_v16, %v91_v15 }
  0xd2   :  { %277 = vmatmul.mubr.bf16.vlgmr.msra.gmra.mxu1 %v95_v18 }
 0x192   :  { %v194_v20 = vpop.f32.mrf.mxu1 }
 0x193   :  { %v201_v21 = vadd.f32 %v194_v20, %v93_v19 }
 0x194   :  { %v278_v22 = vpop.f32.mrf.mxu1 }
 0x195   :  { %203 = vst.msk [vmem:[#allocation2] sm:$0xff] %vm20_vm1, %v201_v21 }
 0x196   :  { %v197_v24 = vpop.f32.mrf.mxu1 }
 0x197   :  { %v202_v25 = vadd.f32 %v197_v24, %v94_v23 }
 0x198   :  { %v279_v26 = vpop.f32.mrf.mxu1 }
 0x199   :  { %204 = vst.msk [vmem:[#allocation2 + $0x8] sm:$0xff] %vm20_vm1, %v202_v25 }
 0x19c   :  { %v208_v27 = vld [vmem:[#allocation2] sm:$0xff] }
 0x19d   :  { %210 = vst.msk [vmem:[#allocation3] sm:$0xff] %vm20_vm1, %v208_v27 }
 0x1a0   :  { %v209_v28 = vld [vmem:[#allocation2 + $0x8] sm:$0xff] }
 0x1a1   :  { %211 = vst.msk [vmem:[#allocation3 + $0x8] sm:$0xff] %vm20_vm1, %v209_v28 }
 0x1a2   :  { %307 = shalt.err (!%p304_p4)
}
 0x1a3   :  { %s321_s7 = smov 128   ;;  %s322_s8 = smov 8  }
 0x1a4   :  { %223 = dma.vmem_to_hbm [thread:$0]  %s218_s5, 256, %s389_s3, [#allocation4], %s321_s7, %s321_s7, %s322_s8  }
 0x1a5   :  { %316 = dma.done.wait [#allocation4], 256  }
 0x1a6   :  { %317 = vsyncadd [#allocation4], 4294967040 }
 0x1a7   :  { %227 = vsyncpa [#allocation4], 1 }

</bundles_post_ra>
